<compile_context>
chip_gen: v7x
topology: tpu7x:2x2x1
jax: 0.10.0
libtpu: 0.0.40
codegen_flags: <defaults>
</compile_context>

<pallas_src>
import functools

import jax
import jax.numpy as jnp
from jax.experimental import pallas as pl
from jax.experimental.pallas import tpu as pltpu


def _round_up(x: int, m: int) -> int:
    return ((x + m - 1) // m) * m


def _default_block_b(batch: int) -> int:
    """Rows per grid block: multiple of 8, aim for >=8 blocks (v7x megacore / pipeline
    overlap), capped so the (TB, V) score intermediates stay comfortably in VMEM."""
    tb = _round_up(max((batch + 7) // 8, 8), 8)
    return min(tb, 1024)


def _skipgram_fused_kernel(cidx_ref, xidx_ref, nidx_ref, ctab_ref, xtab_ref, out_ref,
                           *, batch: int, block_b: int):
    # cidx/xidx: (TB, 1) int32; nidx: (TB, K) int32; tables: (V, D); out: (1, 8, 128)
    ctab = ctab_ref[...].astype(jnp.float32)          # center table (V, D), bf16 ok
    xtab = xtab_ref[...].astype(jnp.float32)          # context table (V, D)
    vocab = ctab.shape[0]

    cidx = cidx_ref[...]                              # (TB, 1)
    xidx = xidx_ref[...]                              # (TB, 1)
    nidx = nidx_ref[...]                              # (TB, K)
    tb = cidx.shape[0]
    num_neg = nidx.shape[1]

    lane_v = jax.lax.broadcasted_iota(jnp.int32, (tb, vocab), 1)

    # Exact gather of the center rows: one-hot (TB,V) @ table (V,D) on the MXU.
    c_oh = (cidx == lane_v).astype(jnp.float32)
    center = jnp.dot(c_oh, ctab, preferred_element_type=jnp.float32)        # (TB, D)

    # Scores of each center row against EVERY context-table row:
    #   S[b, v] = <center[b], context_table[v]>
    # pos/neg scores are one-hot reads of S, so the (B, K, D) negatives gather never exists
    # and the D-reduction runs on the otherwise-idle MXU.
    scores = jax.lax.dot_general(center, xtab, (((1,), (1,)), ((), ())),
                                 preferred_element_type=jnp.float32)         # (TB, V)

    pos_score = jnp.sum(jnp.where(xidx == lane_v, scores, 0.0),
                        axis=-1, keepdims=True)                              # (TB, 1)
    loss_row = jnp.log(jax.nn.sigmoid(pos_score) + 1e-10)

    for k in range(num_neg):                                                 # K small, static
        oh_k = nidx[:, k:k + 1] == lane_v
        neg_score_k = jnp.sum(jnp.where(oh_k, scores, 0.0),
                              axis=-1, keepdims=True)                        # (TB, 1)
        loss_row = loss_row + jnp.log(jax.nn.sigmoid(-neg_score_k) + 1e-10)

    per_row = -loss_row                                                      # (TB, 1)

    # Mask the ragged / padded rows of the final block (select, not multiply).
    row0 = pl.program_id(0) * block_b
    row_ids = row0 + jax.lax.broadcasted_iota(jnp.int32, (tb, 1), 0)
    per_row = jnp.where(row_ids < batch, per_row, 0.0)

    # One (8,128)-aligned partial tile per grid block -> unmasked store, parallel-safe.
    out_ref[...] = jnp.full(out_ref.shape, jnp.sum(per_row), dtype=jnp.float32)


def skipgram_forward(center_table, context_table, center_words, context_words,
                     negative_words, *, block_b=None):
    V, D = center_table.shape
    B = int(center_words.shape[0])
    K = int(negative_words.shape[1])

    if block_b is None:
        block_b = _default_block_b(B)
    tb = max(8, _round_up(min(int(block_b), _round_up(B, 8)), 8))
    b_pad = _round_up(B, tb)
    nblocks = b_pad // tb

    # Only the tiny int32 index vectors get padded (4 B/row) — never the embeddings.
    pad = b_pad - B
    cidx = jnp.pad(center_words.astype(jnp.int32), (0, pad)).reshape(b_pad, 1)
    xidx = jnp.pad(context_words.astype(jnp.int32), (0, pad)).reshape(b_pad, 1)
    nidx = jnp.pad(negative_words.astype(jnp.int32), ((0, pad), (0, 0)))

    kernel = functools.partial(_skipgram_fused_kernel, batch=B, block_b=tb)

    partials = pl.pallas_call(
        kernel,
        out_shape=jax.ShapeDtypeStruct((nblocks, 8, 128), jnp.float32),
        grid=(nblocks,),
        in_specs=[
            pl.BlockSpec((tb, 1), lambda i: (i, 0)),
            pl.BlockSpec((tb, 1), lambda i: (i, 0)),
            pl.BlockSpec((tb, K), lambda i: (i, 0)),
            # Whole embedding tables stay VMEM-resident for the duration of the grid.
            pl.BlockSpec(memory_space=pltpu.MemorySpace.VMEM),
            pl.BlockSpec(memory_space=pltpu.MemorySpace.VMEM),
        ],
        out_specs=pl.BlockSpec((1, 8, 128), lambda i: (i, 0, 0)),
        compiler_params=pltpu.CompilerParams(
            dimension_semantics=("parallel",),
            vmem_limit_bytes=32 * 1024 * 1024),
    )(cidx, xidx, nidx, center_table, context_table)

    # Each block filled its tile with one partial value; pick one copy per block.
    return jnp.sum(partials[:, 0, 0]) / jnp.float32(B)


if __name__ == "__main__":
    vocab_size = 256
    embedding_dim = 128   # lane-dense (multiple of 128)
    batch = 72            # not a multiple of the default 16-row tile -> ragged masked tail
    num_neg = 5

    key = jax.random.PRNGKey(0)
    k1, k2, k3, k4, k5 = jax.random.split(key, 5)

    # nn.Embedding default init: N(0, 1)
    center_table = jax.random.normal(k1, (vocab_size, embedding_dim), jnp.float32)
    context_table = jax.random.normal(k2, (vocab_size, embedding_dim), jnp.float32)

    center_words = jax.random.randint(k3, (batch,), 0, vocab_size, dtype=jnp.int32)
    context_words = jax.random.randint(k4, (batch,), 0, vocab_size, dtype=jnp.int32)
    negative_words = jax.random.randint(k5, (batch, num_neg), 0, vocab_size,
                                        dtype=jnp.int32)

    loss = skipgram_forward(center_table, context_table, center_words,
                            context_words, negative_words)
    loss = jax.block_until_ready(loss)

    # pure-JAX reference (matches the PyTorch forward exactly: explicit gathers + VPU sums)
    ce = center_table[center_words]
    ctx = context_table[context_words]
    ne = context_table[negative_words]
    pos_loss = jnp.log(jax.nn.sigmoid(jnp.sum(ce * ctx, axis=1)) + 1e-10)
    neg_score = jnp.sum(ne * ce[:, None, :], axis=-1)
    neg_loss = jnp.sum(jnp.log(jax.nn.sigmoid(-neg_score) + 1e-10), axis=1)
    ref = jnp.mean(-(pos_loss + neg_loss))

    # N(0,1) embeddings with D=128 give saturated sigmoid scores and the kernel computes
    # the dot products on the MXU, so keep tolerances modest (per the review's numerics note).
    assert jnp.allclose(loss, ref, rtol=2e-3, atol=2e-3), (loss, ref)
    print("KERNEL_OK")
</pallas_src>

<mosaic_0001>
module attributes {stable_mosaic.version = 11 : i64} {
  func.func @_skipgram_fused_kernel(%arg0: i32, %arg1: memref<16x1xi32, #tpu.memory_space<vmem>>, %arg2: memref<16x1xi32, #tpu.memory_space<vmem>>, %arg3: memref<16x5xi32, #tpu.memory_space<vmem>>, %arg4: memref<256x128xf32, #tpu.memory_space<vmem>>, %arg5: memref<256x128xf32, #tpu.memory_space<vmem>>, %arg6: memref<1x8x128xf32, #tpu.memory_space<vmem>>) attributes {dimension_semantics = [#tpu.dimension_semantics<parallel>], iteration_bounds = array<i64: 5>, scalar_prefetch = 0 : i64, scratch_operands = 0 : i64, tpu.core_type = #tpu.core_type<tc>, window_params = [{transform_indices = @transform_0, window_bounds = array<i64: 16, 1>}, {transform_indices = @transform_1, window_bounds = array<i64: 16, 1>}, {transform_indices = @transform_2, window_bounds = array<i64: 16, 5>}, {pipeline_mode = #tpu.pipeline_mode<synchronous>, transform_indices = @transform_3, window_bounds = array<i64: 256, 128>}, {pipeline_mode = #tpu.pipeline_mode<synchronous>, transform_indices = @transform_4, window_bounds = array<i64: 256, 128>}, {transform_indices = @transform_5, window_bounds = array<i64: 1, 8, 128>}]} {
    %c0 = arith.constant 0 : index
    %c0_0 = arith.constant 0 : index
    %0 = vector.load %arg4[%c0, %c0_0] : memref<256x128xf32, #tpu.memory_space<vmem>>, vector<256x128xf32>
    %c0_1 = arith.constant 0 : index
    %c0_2 = arith.constant 0 : index
    %1 = vector.load %arg5[%c0_1, %c0_2] : memref<256x128xf32, #tpu.memory_space<vmem>>, vector<256x128xf32>
    %c0_3 = arith.constant 0 : index
    %c0_4 = arith.constant 0 : index
    %2 = vector.load %arg1[%c0_3, %c0_4] : memref<16x1xi32, #tpu.memory_space<vmem>>, vector<16x1xi32>
    %c0_5 = arith.constant 0 : index
    %c0_6 = arith.constant 0 : index
    %3 = vector.load %arg2[%c0_5, %c0_6] : memref<16x1xi32, #tpu.memory_space<vmem>>, vector<16x1xi32>
    %c0_7 = arith.constant 0 : index
    %c0_8 = arith.constant 0 : index
    %4 = vector.load %arg3[%c0_7, %c0_8] : memref<16x5xi32, #tpu.memory_space<vmem>>, vector<16x5xi32>
    %5 = tpu.iota {dimensions = array<i32: 1>} : vector<16x256xi32>
    %6 = vector.broadcast %2 : vector<16x1xi32> to vector<16x256xi32>
    %7 = arith.cmpi eq, %6, %5 : vector<16x256xi32>
    %8 = arith.extui %7 : vector<16x256xi1> to vector<16x256xi32>
    %9 = arith.sitofp %8 : vector<16x256xi32> to vector<16x256xf32>
    %cst = arith.constant dense<0.000000e+00> : vector<16x128xf32>
    %10 = tpu.matmul %9, %0, %cst {dimension_numbers = #tpu.dot_dimension_numbers<[1], [0], [0], [1], [0, 0, 1, 1], [], []>} : vector<16x256xf32>, vector<256x128xf32>, vector<16x128xf32> -> vector<16x128xf32>
    %cst_9 = arith.constant dense<0.000000e+00> : vector<16x256xf32>
    %11 = tpu.matmul %10, %1, %cst_9 {dimension_numbers = #tpu.dot_dimension_numbers<[1], [1], [0], [0], [0, 0, 1, 0], [], []>} : vector<16x128xf32>, vector<256x128xf32>, vector<16x256xf32> -> vector<16x256xf32>
    %12 = vector.broadcast %3 : vector<16x1xi32> to vector<16x256xi32>
    %13 = arith.cmpi eq, %12, %5 : vector<16x256xi32>
    %cst_10 = arith.constant 0.000000e+00 : f32
    %14 = vector.broadcast %cst_10 : f32 to vector<16x256xf32>
    %15 = arith.select %13, %11, %14 : vector<16x256xi1>, vector<16x256xf32>
    %cst_11 = arith.constant dense<0.000000e+00> : vector<16xf32>
    %16 = vector.multi_reduction <add>, %15, %cst_11 [1] : vector<16x256xf32> to vector<16xf32>
    %17 = vector.shape_cast %16 : vector<16xf32> to vector<16x1xf32>
    %18 = arith.negf %17 : vector<16x1xf32>
    %19 = math.exp %18 : vector<16x1xf32>
    %cst_12 = arith.constant 1.000000e+00 : f32
    %20 = vector.broadcast %cst_12 : f32 to vector<16x1xf32>
    %21 = arith.addf %20, %19 : vector<16x1xf32>
    %22 = arith.divf %20, %21 : vector<16x1xf32>
    %cst_13 = arith.constant 1.000000e-10 : f32
    %23 = vector.broadcast %cst_13 : f32 to vector<16x1xf32>
    %24 = arith.addf %22, %23 : vector<16x1xf32>
    %25 = math.log %24 : vector<16x1xf32>
    %26 = vector.extract_strided_slice %4 {offsets = [0, 0], sizes = [16, 1], strides = [1, 1]} : vector<16x5xi32> to vector<16x1xi32>
    %27 = vector.broadcast %26 : vector<16x1xi32> to vector<16x256xi32>
    %28 = arith.cmpi eq, %27, %5 : vector<16x256xi32>
    %cst_14 = arith.constant 0.000000e+00 : f32
    %29 = vector.broadcast %cst_14 : f32 to vector<16x256xf32>
    %30 = arith.select %28, %11, %29 : vector<16x256xi1>, vector<16x256xf32>
    %cst_15 = arith.constant dense<0.000000e+00> : vector<16xf32>
    %31 = vector.multi_reduction <add>, %30, %cst_15 [1] : vector<16x256xf32> to vector<16xf32>
    %32 = vector.shape_cast %31 : vector<16xf32> to vector<16x1xf32>
    %cst_16 = arith.constant 0.000000e+00 : f32
    %33 = vector.broadcast %cst_16 : f32 to vector<16x1xf32>
    %34 = arith.subf %33, %32 : vector<16x1xf32>
    %35 = arith.negf %34 : vector<16x1xf32>
    %36 = math.exp %35 : vector<16x1xf32>
    %cst_17 = arith.constant 1.000000e+00 : f32
    %37 = vector.broadcast %cst_17 : f32 to vector<16x1xf32>
    %38 = arith.addf %37, %36 : vector<16x1xf32>
    %39 = arith.divf %37, %38 : vector<16x1xf32>
    %cst_18 = arith.constant 1.000000e-10 : f32
    %40 = vector.broadcast %cst_18 : f32 to vector<16x1xf32>
    %41 = arith.addf %39, %40 : vector<16x1xf32>
    %42 = math.log %41 : vector<16x1xf32>
    %43 = arith.addf %25, %42 : vector<16x1xf32>
    %44 = vector.extract_strided_slice %4 {offsets = [0, 1], sizes = [16, 1], strides = [1, 1]} : vector<16x5xi32> to vector<16x1xi32>
    %45 = vector.broadcast %44 : vector<16x1xi32> to vector<16x256xi32>
    %46 = arith.cmpi eq, %45, %5 : vector<16x256xi32>
    %cst_19 = arith.constant 0.000000e+00 : f32
    %47 = vector.broadcast %cst_19 : f32 to vector<16x256xf32>
    %48 = arith.select %46, %11, %47 : vector<16x256xi1>, vector<16x256xf32>
    %cst_20 = arith.constant dense<0.000000e+00> : vector<16xf32>
    %49 = vector.multi_reduction <add>, %48, %cst_20 [1] : vector<16x256xf32> to vector<16xf32>
    %50 = vector.shape_cast %49 : vector<16xf32> to vector<16x1xf32>
    %cst_21 = arith.constant 0.000000e+00 : f32
    %51 = vector.broadcast %cst_21 : f32 to vector<16x1xf32>
    %52 = arith.subf %51, %50 : vector<16x1xf32>
    %53 = arith.negf %52 : vector<16x1xf32>
    %54 = math.exp %53 : vector<16x1xf32>
    %cst_22 = arith.constant 1.000000e+00 : f32
    %55 = vector.broadcast %cst_22 : f32 to vector<16x1xf32>
    %56 = arith.addf %55, %54 : vector<16x1xf32>
    %57 = arith.divf %55, %56 : vector<16x1xf32>
    %cst_23 = arith.constant 1.000000e-10 : f32
    %58 = vector.broadcast %cst_23 : f32 to vector<16x1xf32>
    %59 = arith.addf %57, %58 : vector<16x1xf32>
    %60 = math.log %59 : vector<16x1xf32>
    %61 = arith.addf %43, %60 : vector<16x1xf32>
    %62 = vector.extract_strided_slice %4 {offsets = [0, 2], sizes = [16, 1], strides = [1, 1]} : vector<16x5xi32> to vector<16x1xi32>
    %63 = vector.broadcast %62 : vector<16x1xi32> to vector<16x256xi32>
    %64 = arith.cmpi eq, %63, %5 : vector<16x256xi32>
    %cst_24 = arith.constant 0.000000e+00 : f32
    %65 = vector.broadcast %cst_24 : f32 to vector<16x256xf32>
    %66 = arith.select %64, %11, %65 : vector<16x256xi1>, vector<16x256xf32>
    %cst_25 = arith.constant dense<0.000000e+00> : vector<16xf32>
    %67 = vector.multi_reduction <add>, %66, %cst_25 [1] : vector<16x256xf32> to vector<16xf32>
    %68 = vector.shape_cast %67 : vector<16xf32> to vector<16x1xf32>
    %cst_26 = arith.constant 0.000000e+00 : f32
    %69 = vector.broadcast %cst_26 : f32 to vector<16x1xf32>
    %70 = arith.subf %69, %68 : vector<16x1xf32>
    %71 = arith.negf %70 : vector<16x1xf32>
    %72 = math.exp %71 : vector<16x1xf32>
    %cst_27 = arith.constant 1.000000e+00 : f32
    %73 = vector.broadcast %cst_27 : f32 to vector<16x1xf32>
    %74 = arith.addf %73, %72 : vector<16x1xf32>
    %75 = arith.divf %73, %74 : vector<16x1xf32>
    %cst_28 = arith.constant 1.000000e-10 : f32
    %76 = vector.broadcast %cst_28 : f32 to vector<16x1xf32>
    %77 = arith.addf %75, %76 : vector<16x1xf32>
    %78 = math.log %77 : vector<16x1xf32>
    %79 = arith.addf %61, %78 : vector<16x1xf32>
    %80 = vector.extract_strided_slice %4 {offsets = [0, 3], sizes = [16, 1], strides = [1, 1]} : vector<16x5xi32> to vector<16x1xi32>
    %81 = vector.broadcast %80 : vector<16x1xi32> to vector<16x256xi32>
    %82 = arith.cmpi eq, %81, %5 : vector<16x256xi32>
    %cst_29 = arith.constant 0.000000e+00 : f32
    %83 = vector.broadcast %cst_29 : f32 to vector<16x256xf32>
    %84 = arith.select %82, %11, %83 : vector<16x256xi1>, vector<16x256xf32>
    %cst_30 = arith.constant dense<0.000000e+00> : vector<16xf32>
    %85 = vector.multi_reduction <add>, %84, %cst_30 [1] : vector<16x256xf32> to vector<16xf32>
    %86 = vector.shape_cast %85 : vector<16xf32> to vector<16x1xf32>
    %cst_31 = arith.constant 0.000000e+00 : f32
    %87 = vector.broadcast %cst_31 : f32 to vector<16x1xf32>
    %88 = arith.subf %87, %86 : vector<16x1xf32>
    %89 = arith.negf %88 : vector<16x1xf32>
    %90 = math.exp %89 : vector<16x1xf32>
    %cst_32 = arith.constant 1.000000e+00 : f32
    %91 = vector.broadcast %cst_32 : f32 to vector<16x1xf32>
    %92 = arith.addf %91, %90 : vector<16x1xf32>
    %93 = arith.divf %91, %92 : vector<16x1xf32>
    %cst_33 = arith.constant 1.000000e-10 : f32
    %94 = vector.broadcast %cst_33 : f32 to vector<16x1xf32>
    %95 = arith.addf %93, %94 : vector<16x1xf32>
    %96 = math.log %95 : vector<16x1xf32>
    %97 = arith.addf %79, %96 : vector<16x1xf32>
    %98 = vector.extract_strided_slice %4 {offsets = [0, 4], sizes = [16, 1], strides = [1, 1]} : vector<16x5xi32> to vector<16x1xi32>
    %99 = vector.broadcast %98 : vector<16x1xi32> to vector<16x256xi32>
    %100 = arith.cmpi eq, %99, %5 : vector<16x256xi32>
    %cst_34 = arith.constant 0.000000e+00 : f32
    %101 = vector.broadcast %cst_34 : f32 to vector<16x256xf32>
    %102 = arith.select %100, %11, %101 : vector<16x256xi1>, vector<16x256xf32>
    %cst_35 = arith.constant dense<0.000000e+00> : vector<16xf32>
    %103 = vector.multi_reduction <add>, %102, %cst_35 [1] : vector<16x256xf32> to vector<16xf32>
    %104 = vector.shape_cast %103 : vector<16xf32> to vector<16x1xf32>
    %cst_36 = arith.constant 0.000000e+00 : f32
    %105 = vector.broadcast %cst_36 : f32 to vector<16x1xf32>
    %106 = arith.subf %105, %104 : vector<16x1xf32>
    %107 = arith.negf %106 : vector<16x1xf32>
    %108 = math.exp %107 : vector<16x1xf32>
    %cst_37 = arith.constant 1.000000e+00 : f32
    %109 = vector.broadcast %cst_37 : f32 to vector<16x1xf32>
    %110 = arith.addf %109, %108 : vector<16x1xf32>
    %111 = arith.divf %109, %110 : vector<16x1xf32>
    %cst_38 = arith.constant 1.000000e-10 : f32
    %112 = vector.broadcast %cst_38 : f32 to vector<16x1xf32>
    %113 = arith.addf %111, %112 : vector<16x1xf32>
    %114 = math.log %113 : vector<16x1xf32>
    %115 = arith.addf %97, %114 : vector<16x1xf32>
    %cst_39 = arith.constant 0.000000e+00 : f32
    %116 = vector.broadcast %cst_39 : f32 to vector<16x1xf32>
    %117 = arith.subf %116, %115 : vector<16x1xf32>
    %c16_i32 = arith.constant 16 : i32
    %118 = arith.muli %arg0, %c16_i32 : i32
    %119 = tpu.iota {dimensions = array<i32: 0>} : vector<16x1xi32>
    %120 = vector.broadcast %118 : i32 to vector<16x1xi32>
    %121 = arith.addi %120, %119 : vector<16x1xi32>
    %c72_i32 = arith.constant 72 : i32
    %122 = vector.broadcast %c72_i32 : i32 to vector<16x1xi32>
    %123 = arith.cmpi slt, %121, %122 : vector<16x1xi32>
    %cst_40 = arith.constant 0.000000e+00 : f32
    %124 = vector.broadcast %cst_40 : f32 to vector<16x1xf32>
    %125 = arith.select %123, %117, %124 : vector<16x1xi1>, vector<16x1xf32>
    %126 = vector.shape_cast %125 : vector<16x1xf32> to vector<1x16x1xf32>
    %cst_41 = arith.constant dense<0.000000e+00> : vector<1xf32>
    %127 = vector.multi_reduction <add>, %126, %cst_41 [1, 2] : vector<1x16x1xf32> to vector<1xf32>
    %128 = vector.shape_cast %127 : vector<1xf32> to vector<1x1x1xf32>
    %129 = vector.extract %128[0, 0, 0] : f32 from vector<1x1x1xf32>
    %130 = vector.broadcast %129 : f32 to vector<1x8x128xf32>
    %c0_42 = arith.constant 0 : index
    %c0_43 = arith.constant 0 : index
    %c0_44 = arith.constant 0 : index
    %131 = vector.load %arg6[%c0_42, %c0_43, %c0_44] : memref<1x8x128xf32, #tpu.memory_space<vmem>>, vector<1x8x128xf32>
    tpu.vector_store %arg6[%c0_42, %c0_43, %c0_44], %130 {strides = array<i32>} : memref<1x8x128xf32, #tpu.memory_space<vmem>>, vector<1x8x128xf32>,
    return
  }
  func.func @transform_0(%arg0: i32) -> (i32, i32) {
    %c0_i32 = arith.constant 0 : i32
    %c0_i32_0 = arith.constant 0 : i32
    return %arg0, %c0_i32 : i32, i32
  }
  func.func @transform_1(%arg0: i32) -> (i32, i32) {
    %c0_i32 = arith.constant 0 : i32
    %c0_i32_0 = arith.constant 0 : i32
    return %arg0, %c0_i32 : i32, i32
  }
  func.func @transform_2(%arg0: i32) -> (i32, i32) {
    %c0_i32 = arith.constant 0 : i32
    %c0_i32_0 = arith.constant 0 : i32
    return %arg0, %c0_i32 : i32, i32
  }
  func.func @transform_3(%arg0: i32) -> (i32, i32) {
    %c0_i32 = arith.constant 0 : i32
    %c0_i32_0 = arith.constant 0 : i32
    %c0_i32_1 = arith.constant 0 : i32
    return %c0_i32, %c0_i32_0 : i32, i32
  }
  func.func @transform_4(%arg0: i32) -> (i32, i32) {
    %c0_i32 = arith.constant 0 : i32
    %c0_i32_0 = arith.constant 0 : i32
    %c0_i32_1 = arith.constant 0 : i32
    return %c0_i32, %c0_i32_0 : i32, i32
  }
  func.func @transform_5(%arg0: i32) -> (i32, i32, i32) {
    %c0_i32 = arith.constant 0 : i32
    %c0_i32_0 = arith.constant 0 : i32
    %c0_i32_1 = arith.constant 0 : i32
    return %arg0, %c0_i32, %c0_i32_0 : i32, i32, i32
  }
}

</mosaic_0001>

<bundles_post_ra>
// kernel: tpu_custom_call.1
= control target key start
LH: loop header
LB: loop body
LE: loop exit
PB: predicated region body
PF: predicated region fallthrough
CT: control target
= control target key end

     0   :  { %10 = vsyncpa [#allocation3], 0  ;;  %s1706_s0 = inlined_call_operand.vmem [shape: s32[80,1], index: 0, kind: input, shape index: {}]   ;;  %s1707_s1 = inlined_call_operand.vmem [shape: s32[80,1], index: 1, kind: input, shape index: {}]   ;;  %s1708_s2 = inlined_call_operand.vmem [shape: s32[80,5], index: 2, kind: input, shape index: {}]   ;;  %s1709_s3 = inlined_call_operand.vmem [shape: f32[256,128], index: 3, kind: input, shape index: {}]   ;;  %s1710_s4 = inlined_call_operand.hbm [shape: f32[256,128], index: 4, kind: input, shape index: {}]   ;;  %s1711_s5 = inlined_call_operand.hbm [shape: f32[5,8,128], index: 5, kind: output, shape index: {}]  }
   0x1   :  { %11 = vsyncpa [#allocation4], 0 }
   0x2   :  { %13 = vsyncpa [#allocation4 + $0x1], 0  ;;  %s1365_s18 = smov 0   ;;  %s1367_s19 = smov 0  }
   0x3   :  { %s1369_s20 = smov 0   ;;  %s1371_s21 = smov 0  }
   0x4 LB: > { %s1386_s22 = sadd.s32 4294967295, %s1323_s21   ;;  %s912_s23 = sadd.s32 4294967294, %s1323_s21   ;;  %s1323_s21 = sphi %s1371_s21, %s1735_s21   ;;  %s1319_s20 = sphi %s1369_s20, %s1734_s20   ;;  %s1315_s19 = sphi %s1367_s19, %s1733_s19   ;;  %s1311_s18 = sphi %s1365_s18, %s1732_s18  }
   0x5   : > { %s1390_s24 = sadd.s32 1, %s1323_s21   ;;  %s146_s25 = sadd.s32 1, %s1319_s20 }
   0x6   : > { %s143_s26 = ssub.s32 %s1323_s21, %s1390_s24  ;;  %p156_p0 = scmp.ne.s32.totalorder %s1319_s20, %s1315_s19 }
   0x7   : > { %p144_p1 = scmp.eq.s32.totalorder %s143_s26, 0  ;;  %p157_p2 = scmp.eq.s32.totalorder %s1386_s22, 4 }
   0x8   : > { %p162_p3 = scmp.ne.s32.totalorder %s1315_s19, %s1311_s18  ;;  %p163_p4 = scmp.eq.s32.totalorder %s912_s23, 4 }
   0x9   : > { %s1401_s27 = scalar_select %p144_p1, %s1319_s20, %s146_s25  }
   0xa   : > { %p1403_p5 = por %p157_p2, %p156_p0  ;;  %p1407_p6 = por %p163_p4, %p162_p3 }
   0xb   : > { %p913_p7 = scmp.ge.s32.totalorder %s1323_s21, 1  ;;  %p170_p8 = scmp.lt.s32.totalorder %s1323_s21, 6 }
   0xc   : > { %s1715_s28 = scalar_select %p1403_p5, 1, 0 }
   0xd   : > { %s1716_s29 = scalar_select %p1407_p6, 1, 0 }
   0xe   : > { %p1712_p9 = scmp.eq.s32.totalorder %s1386_s22, 0  ;;  %p1414_p10 = pnand %p913_p7, %p170_p8 }
   0xf   : > { %s1325_s6 = smov [#allocation2]   ;;  %s1229_s11 = scalar_lea.hbm %s1710_s4, 4096 }
  0x10   : > { %s1717_s30 = scalar_select %p1414_p10, 1, 0 }
  0x11   : > { %s185_s7 = sshll.u32 %s1325_s6, 4  ;;  %p1096_p11 = pneg %p1414_p10  ;;  %s186_s7 = int_to_ptr.vmem [resolvable:$true] %s185_s7 }
  0x12   : > { %p1230_p13 = scmp.ne.s32.totalorder %s1710_s4, %s1229_s11  ;;  %p1236_p3 = scmp.lt.u32.totalorder %s1229_s11, %s1710_s4 }
  0x13   : > { %p1422_p12 = pnand %p1712_p9, %p1096_p11 }
  0x15   : > { %p1231_p0 = pneg %p1422_p12 }
  0x17   : > { %p1232_p1 = pnand %p1231_p0, %p1230_p13 }
  0x19   : > { %p1233_p2 = pneg %p1232_p1 }
  0x1b   : > { %p1238_p4 = pnand %p1236_p3, %p1233_p2 }
  0x1d   : > { %1241 = shalt.err (!%p1238_p4)
}
  0x1e   : > { %s1242_s16 = scalar_lea.vmem %s186_s7, 4096  ;;  %p1250_p9 = scmp.lt.s32.totalorder %s186_s7, %s186_s7 }
  0x1f   : > { %p1243_p7 = scmp.ne.s32.totalorder %s186_s7, %s1242_s16  ;;  %p1251_p6 = scmp.lt.s32.totalorder %s1242_s16, %s1242_s16 }
  0x21   : > { %p1245_p8 = pnand %p1243_p7, %p1231_p0  ;;  %p1252_p5 = por %p1251_p6, %p1250_p9 }
  0x23   : > { %p1246_p11 = pneg %p1245_p8 }
  0x25   : > { %p1253_p10 = pnand %p1252_p5, %p1246_p11 }
  0x27   : > { %1256 = shalt.err (!%p1253_p10)
}
  0x28   : > { %s1326_s17 = smov 128   ;;  %s1327_s23 = smov 8  }
  0x29   : > { %1099 = dma.hbm_to_vmem [thread:$0]  (!%p1422_p12), %s1710_s4, 4096, %s186_s7, [#allocation3], %s1326_s17, %s1326_s17, %s1327_s23  }
  0x2a   : > { %p1719_p13 = scmp.ne.s32.totalorder %s1717_s30, 0 }
  0x2b   : > { %p1720_p1 = scmp.eq.s32.totalorder (!%p1719_p13), %s1386_s22, 0 }
  0x2c   : > { %228 = sbr.rel (%p1719_p13) target bundleno = 1058 (0x422), region = 40 }
  0x33   : > { %1302 = dma.done.wait (%p1720_p1), [#allocation3], 4096   ;;  %p1721_p0 = pmov %p1720_p1 }
  0x34   : > { %s919_s6 = sshll.u32 %s1386_s22, 1  ;;  %v1328_v0 = vmov 0   ;;  %v300_v2 = vld [vmem:[%s1709_s3 + $0x80] sm:$0xff]  ;;  %v301_v4 = vld [vmem:[%s1709_s3 + $0x88] sm:$0xff]  ;;  %v302_v8 = vld [vmem:[%s1709_s3 + $0x90] sm:$0xff]  ;;  %s947_s12 = sshll.u32 %s1386_s22, 7 }
  0x35   : > { %1304 = vsyncadd (%p1721_p0), [#allocation3], 4294963200  ;;  %1148 = vset.pattern.permute.xlu0 %v1328_v0  ;;  %p267_p5 = scmp.lt.s32.totalorder %s919_s6, 9  ;;  %1149 = vset.pattern.permute.xlu1 %v1328_v0  ;;  %v284_v5 = vld [vmem:[%s1709_s3] sm:$0xff]  ;;  %v1024_v6 = vpack.c.bf16 %v301_v4, %v300_v2  ;;  %v285_v7 = vld [vmem:[%s1709_s3 + $0x8] sm:$0xff]  ;;  %s1666_s16 = scalar_lea.hbm %s1711_s5, %s947_s12 }
  0x36   : > { %v303_v9 = vld [vmem:[%s1709_s3 + $0x98] sm:$0xff]  ;;  %v1026_v10 = vpack.c.bf16 %v285_v7, %v284_v5  ;;  %v286_v12 = vld [vmem:[%s1709_s3 + $0x10] sm:$0xff]  ;;  %v304_v14 = vld [vmem:[%s1709_s3 + $0xa0] sm:$0xff]  ;;  %p1730_p9 = scmp.ne.s32.totalorder %s1715_s28, 0 }
  0x37   : > { %s1737_s6 = smov (!%p267_p5, %s919_s6), 9  ;;  %v1028_v11 = vpack.c.bf16 %v303_v9, %v302_v8  ;;  %v287_v13 = vld [vmem:[%s1709_s3 + $0x18] sm:$0xff]  ;;  %1025 = vmatprep.subr.bf16.mxu0 %v1024_v6  ;;  %v305_v15 = vld [vmem:[%s1709_s3 + $0xa8] sm:$0xff]  ;;  %v288_v19 = vld [vmem:[%s1709_s3 + $0x20] sm:$0xff] }
  0x38   : > { %s1449_s8 = sshll.u32 %s1737_s6, 3  ;;  %1027 = vmatpush3.bf16.msra.mxu0 %v1026_v10  ;;  %v1030_v16 = vpack.c.bf16 %v287_v13, %v286_v12  ;;  %v1032_v18 = vpack.c.bf16 %v305_v15, %v304_v14  ;;  %v289_v20 = vld [vmem:[%s1709_s3 + $0x28] sm:$0xff]  ;;  %v306_v21 = vld [vmem:[%s1709_s3 + $0xb0] sm:$0xff]  ;;  %v307_v22 = vld [vmem:[%s1709_s3 + $0xb8] sm:$0xff] }
  0x39   : > { %s270_s30 = scalar_lea.vmem %s1706_s0, %s1449_s8  ;;  %1029 = vmatprep.subr.bf16.mxu0 %v1028_v11  ;;  %v1034_v23 = vpack.c.bf16 %v289_v20, %v288_v19  ;;  %v1036_v24 = vpack.c.bf16 %v307_v22, %v306_v21  ;;  %v290_v25 = vld [vmem:[%s1709_s3 + $0x30] sm:$0xff]  ;;  %v291_v26 = vld [vmem:[%s1709_s3 + $0x38] sm:$0xff]  ;;  %v308_v27 = vld [vmem:[%s1709_s3 + $0xc0] sm:$0xff]  ;;  %s282_s7 = scalar_lea.vmem %s1708_s2, %s1449_s8 }
  0x3a   : > { %v348_v1 = vld [vmem:[%s270_s30] sm:$0xff]  ;;  %v349_v3 = vld [vmem:[%s270_s30 + $0x8] sm:$0xff]  ;;  %s1477_s30 = scalar_lea.vmem %s1707_s1, %s1449_s8  ;;  %v1038_v33 = vpack.c.bf16 %v291_v26, %v290_v25  ;;  %v334_v36 = vld [vmem:[#allocation2 + $0x90] sm:$0xff]  ;;  %s945_s8 = sshll.u32 %s1386_s22, 4 }
  0x3b   : > { %358 = vperm.xlu0 %1148, %v348_v1   ;;  %v350_v17 = vld [vmem:[%s1477_s30] sm:$0xff]  ;;  %v309_v28 = vld [vmem:[%s1709_s3 + $0xc8] sm:$0xff]  ;;  %v335_v37 = vld [vmem:[#allocation2 + $0x98] sm:$0xff]  ;;  %s1334_s22 = smov [#allocation5]  }
  0x3c   : > { %1031 = vmatpush3.bf16.msra.mxu0 %v1030_v16  ;;  %v332_v29 = vld [vmem:[#allocation2 + $0x80] sm:$0xff]  ;;  %v333_v30 = vld [vmem:[#allocation2 + $0x88] sm:$0xff]  ;;  %v1040_v38 = vpack.c.bf16 %v309_v28, %v308_v27  ;;  %v1060_v41 = vpack.c.bf16 %v335_v37, %v334_v36  ;;  %v310_v42 = vld [vmem:[%s1709_s3 + $0xd0] sm:$0xff]  ;;  %v354_v36 = vlaneseq  ;;  %s1261_s25 = sshll.u32 %s1334_s22, 4  ;;  %s1262_s25 = int_to_ptr.vmem [resolvable:$false] %s1261_s25 }
  0x3d   : > { %1033 = vmatprep.subr.bf16.mxu0 %v1032_v18  ;;  %v316_v31 = vld [vmem:[#allocation2] sm:$0xff]  ;;  %v317_v32 = vld [vmem:[#allocation2 + $0x8] sm:$0xff]  ;;  %v1056_v34 = vpack.c.bf16 %v333_v30, %v332_v29  ;;  %v311_v43 = vld [vmem:[%s1709_s3 + $0xd8] sm:$0xff]  ;;  %s1263_s26 = scalar_lea.vmem %s1262_s25, 256 }
  0x3e   : > { %v1058_v35 = vpack.c.bf16 %v317_v32, %v316_v31  ;;  %v292_v39 = vld [vmem:[%s1709_s3 + $0x40] sm:$0xff]  ;;  %v293_v40 = vld [vmem:[%s1709_s3 + $0x48] sm:$0xff]  ;;  %v294_v45 = vld [vmem:[%s1709_s3 + $0x50] sm:$0xff]  ;;  %v1044_v48 = vpack.c.bf16 %v311_v43, %v310_v42  ;;  %v1559_v37 = vand.u32 127, %v354_v36  ;;  %v1330_v43 = vmov 1  }
  0x3f   : > { %361 = vperm.xlu0 %1148, %v349_v3   ;;  %1057 = vmatprep.subr.bf16.mxu1 %v1056_v34  ;;  %v1042_v44 = vpack.c.bf16 %v293_v40, %v292_v39  ;;  %v318_v46 = vld [vmem:[#allocation2 + $0x10] sm:$0xff]  ;;  %v319_v47 = vld [vmem:[#allocation2 + $0x18] sm:$0xff]  ;;  %v336_v50 = vld [vmem:[#allocation2 + $0xa0] sm:$0xff]  ;;  %v1329_v40 = vmov 1.0  }
  0x40   : > { %1035 = vmatpush3.bf16.msra.mxu0 %v1034_v23  ;;  %1059 = vmatpush3.bf16.xpose.msra.mxu1 %v1058_v35  ;;  %v295_v49 = vld [vmem:[%s1709_s3 + $0x58] sm:$0xff]  ;;  %v337_v51 = vld [vmem:[#allocation2 + $0xa8] sm:$0xff]  ;;  %v312_v52 = vld [vmem:[%s1709_s3 + $0xe0] sm:$0xff]  ;;  %v1062_v54 = vpack.c.bf16 %v319_v47, %v318_v46  ;;  %v1331_v46 = vmov 2   ;;  %v1332_v47 = vmov 4  }
  0x41   : > { %1037 = vmatprep.subr.bf16.mxu0 %v1036_v24  ;;  %1061 = vmatprep.subr.bf16.mxu1 %v1060_v41  ;;  %v313_v53 = vld [vmem:[%s1709_s3 + $0xe8] sm:$0xff]  ;;  %v1046_v55 = vpack.c.bf16 %v295_v49, %v294_v45  ;;  %v1064_v56 = vpack.c.bf16 %v337_v51, %v336_v50  ;;  %v296_v58 = vld [vmem:[%s1709_s3 + $0x60] sm:$0xff]  ;;  %v314_v60 = vld [vmem:[%s1709_s3 + $0xf0] sm:$0xff] }
  0x42   : > { %v1048_v57 = vpack.c.bf16 %v313_v53, %v312_v52  ;;  %v297_v59 = vld [vmem:[%s1709_s3 + $0x68] sm:$0xff]  ;;  %v315_v61 = vld [vmem:[%s1709_s3 + $0xf8] sm:$0xff]  ;;  %v298_v63 = vld [vmem:[%s1709_s3 + $0x70] sm:$0xff] }
  0x43   : > { %528 = vperm.xlu0 %1148, %v350_v17   ;;  %v1050_v62 = vpack.c.bf16 %v297_v59, %v296_v58  ;;  %v320_v0 = vld [vmem:[#allocation2 + $0x20] sm:$0xff]  ;;  %v321_v1 = vld [vmem:[#allocation2 + $0x28] sm:$0xff]  ;;  %v1052_v2 = vpack.c.bf16 %v315_v61, %v314_v60  ;;  %v299_v3 = vld [vmem:[%s1709_s3 + $0x78] sm:$0xff] }
  0x44   : > { %1039 = vmatpush3.bf16.msra.mxu0 %v1038_v33  ;;  %v338_v4 = vld [vmem:[#allocation2 + $0xb0] sm:$0xff]  ;;  %v339_v5 = vld [vmem:[#allocation2 + $0xb8] sm:$0xff]  ;;  %v1066_v6 = vpack.c.bf16 %v321_v1, %v320_v0  ;;  %v1054_v7 = vpack.c.bf16 %v299_v3, %v298_v63  ;;  %v340_v11 = vld [vmem:[#allocation2 + $0xc0] sm:$0xff] }
  0x45   : > { %1041 = vmatprep.subr.bf16.mxu0 %v1040_v38  ;;  %v1068_v8 = vpack.c.bf16 %v339_v5, %v338_v4  ;;  %v322_v9 = vld [vmem:[#allocation2 + $0x30] sm:$0xff]  ;;  %v323_v10 = vld [vmem:[#allocation2 + $0x38] sm:$0xff]  ;;  %v341_v12 = vld [vmem:[#allocation2 + $0xc8] sm:$0xff]  ;;  %v1562_v38 = vadd.s32 128, %v1559_v37 }
  0x46   : > { %v1070_v13 = vpack.c.bf16 %v323_v10, %v322_v9  ;;  %v1072_v14 = vpack.c.bf16 %v341_v12, %v340_v11  ;;  %v324_v15 = vld [vmem:[#allocation2 + $0x40] sm:$0xff]  ;;  %v325_v16 = vld [vmem:[#allocation2 + $0x48] sm:$0xff]  ;;  %v342_v17 = vld [vmem:[#allocation2 + $0xd0] sm:$0xff] }
  0x47   : > { %v343_v18 = vld [vmem:[#allocation2 + $0xd8] sm:$0xff]  ;;  %v1074_v19 = vpack.c.bf16 %v325_v16, %v324_v15  ;;  %v326_v21 = vld [vmem:[#allocation2 + $0x50] sm:$0xff]  ;;  %v344_v23 = vld [vmem:[#allocation2 + $0xe0] sm:$0xff]  ;;  %1150 = vset.pattern.permute.xlu0 %v1330_v43 }
  0x48   : > { %1043 = vmatpush3.bf16.msra.mxu0 %v1042_v44  ;;  %1063 = vmatpush3.bf16.xpose.msra.mxu1 %v1062_v54  ;;  %v1076_v20 = vpack.c.bf16 %v343_v18, %v342_v17  ;;  %v327_v22 = vld [vmem:[#allocation2 + $0x58] sm:$0xff]  ;;  %v345_v24 = vld [vmem:[#allocation2 + $0xe8] sm:$0xff]  ;;  %v328_v27 = vld [vmem:[#allocation2 + $0x60] sm:$0xff] }
  0x49   : > { %1045 = vmatprep.subr.bf16.mxu0 %v1044_v48  ;;  %1065 = vmatprep.subr.bf16.mxu1 %v1064_v56  ;;  %v1078_v25 = vpack.c.bf16 %v327_v22, %v326_v21  ;;  %v1080_v26 = vpack.c.bf16 %v345_v24, %v344_v23  ;;  %v329_v28 = vld [vmem:[#allocation2 + $0x68] sm:$0xff]  ;;  %v346_v29 = vld [vmem:[#allocation2 + $0xf0] sm:$0xff]  ;;  %v347_v30 = vld [vmem:[#allocation2 + $0xf8] sm:$0xff]  ;;  %v1333_v48 = vmov 3  }
  0x4a   : > { %v1082_v31 = vpack.c.bf16 %v329_v28, %v328_v27  ;;  %v1084_v32 = vpack.c.bf16 %v347_v30, %v346_v29  ;;  %v330_v33 = vld [vmem:[#allocation2 + $0x70] sm:$0xff]  ;;  %v331_v34 = vld [vmem:[#allocation2 + $0x78] sm:$0xff]  ;;  %v352_v42 = vld [vmem:[%s282_s7] sm:$0xff] }
  0x4b   : > { %v1086_v35 = vpack.c.bf16 %v331_v34, %v330_v33  ;;  %566 = vperm.xlu1 %1149, %v352_v42   ;;  %v353_v44 = vld [vmem:[%s282_s7 + $0x8] sm:$0xff]  ;;  %608 = vperm.xlu0 %1150, %v352_v42  }
  0x4c   : > { %1047 = vmatpush3.bf16.msra.mxu0 %v1046_v55  ;;  %v351_v45 = vld [vmem:[%s1477_s30 + $0x8] sm:$0xff]  ;;  %s263_s30 = sand.u32 1, %s1315_s19  }
  0x4d   : > { %1049 = vmatprep.subr.bf16.mxu0 %v1048_v57  ;;  %s918_s9 = sshll.u32 %s263_s30, 3  ;;  %s804_s17 = scalar_lea.sflag [#allocation4], %s263_s30 }
  0x4e   : > { %s265_s10 = scalar_lea.vmem [#allocation5], %s918_s9 }
  0x4f   : > { %569 = vperm.xlu1 %1149, %v353_v44   ;;  %1153 = vset.pattern.permute.xlu0 %v1331_v46  ;;  %s817_s11 = sshll.u32 %s265_s10, 4  ;;  %s1661_s11 = int_to_ptr.vmem [resolvable:$true] %s817_s11 }
  0x50   : > { %1051 = vmatpush3.bf16.msra.mxu0 %v1050_v62  ;;  %1067 = vmatpush3.bf16.xpose.msra.mxu1 %v1066_v6  ;;  %s1257_s23 = scalar_lea.vmem %s1661_s11, 128  ;;  %p1264_p2 = scmp.lt.s32.totalorder %s1661_s11, %s1262_s25 }
  0x51   : > { %1053 = vmatprep.subr.bf16.mxu0 %v1052_v2  ;;  %1069 = vmatprep.subr.bf16.mxu1 %v1068_v8  ;;  %p1258_p6 = scmp.ne.s32.totalorder %s1661_s11, %s1257_s23  ;;  %p1265_p3 = scmp.lt.s32.totalorder %s1263_s26, %s1257_s23 }
  0x52   : > { %653 = vperm.xlu0 %1153, %v353_v44  }
  0x53   : > { %531 = vperm.xlu1 %1149, %v351_v45   ;;  %p1259_p10 = pnand %p1258_p6, %p1730_p9  ;;  %p1266_p4 = por %p1265_p3, %p1264_p2 }
  0x54   : > { %1055 = vmatpush3.bf16.msra.mxu0 %v1054_v7 }
  0x55   : > { %p1260_p12 = pneg %p1259_p10 }
  0x56   : > { %1155 = vset.pattern.permute.xlu0 %v1332_v47 }
  0x57   : > { %734 = vperm.xlu0 %1155, %v352_v42   ;;  %1151 = vset.pattern.permute.xlu1 %v1330_v43  ;;  %p1267_p7 = pnand %p1266_p4, %p1260_p12 }
  0x58   : > { %1071 = vmatpush3.bf16.xpose.msra.mxu1 %v1070_v13  ;;  %611 = vperm.xlu1 %1151, %v353_v44  }
  0x59   : > { %1073 = vmatprep.subr.bf16.mxu1 %v1072_v14 }
  0x5c   : > { %1152 = vset.pattern.permute.xlu1 %v1331_v46 }
  0x5d   : > { %650 = vperm.xlu1 %1152, %v352_v42  }
  0x60   : > { %1075 = vmatpush3.bf16.xpose.msra.mxu1 %v1074_v19 }
  0x61   : > { %1077 = vmatprep.subr.bf16.mxu1 %v1076_v20  ;;  %1154 = vset.pattern.permute.xlu1 %v1333_v48 }
  0x62   : > { %692 = vperm.xlu1 %1154, %v352_v42  }
  0x66   : > { %695 = vperm.xlu1 %1154, %v353_v44  }
  0x68   : > { %1079 = vmatpush3.bf16.xpose.msra.mxu1 %v1078_v25 }
  0x69   : > { %1081 = vmatprep.subr.bf16.mxu1 %v1080_v26 }
  0x6a   : > { %1156 = vset.pattern.permute.xlu1 %v1332_v47 }
  0x6b   : > { %737 = vperm.xlu1 %1156, %v353_v44  }
  0x70   : > { %1083 = vmatpush3.bf16.xpose.msra.mxu1 %v1082_v31 }
  0x71   : > { %1085 = vmatprep.subr.bf16.mxu1 %v1084_v32 }
  0x78   : > { %1087 = vmatpush3.bf16.xpose.msra.mxu1 %v1086_v35 }
  0xba   : > { %v359_v39 = vpop.permute.xlu0 %358 }
  0xbb   : > { %vm363_vm0 = vcmp.eq.s32.totalorder %v359_v39, %v1559_v37  ;;  %vm364_vm1 = vcmp.eq.s32.totalorder %v359_v39, %v1562_v38 }
  0xbc   : > { %929 = vmatprep.mubr.msk.f32.mxu0 %vm364_vm1, %v1329_v40 }
  0xbd   : > { %930 = vmatmul.mubr.msk.f32.vlgmr.msra.gmra.mrb[0].mxu0 %vm363_vm0, %v1329_v40 }
  0xbe   : > { %v362_v41 = vpop.permute.xlu0 %361 }
  0xbf   : > { %vm365_vm2 = vcmp.eq.s32.totalorder %v362_v41, %v1559_v37  ;;  %vm366_vm3 = vcmp.eq.s32.totalorder %v362_v41, %v1562_v38 }
  0xc0   : > { %931 = vmatprep.mubr.msk.f32.mxu0 %vm366_vm3, %v1329_v40 }
  0xc1   : > { %932 = vmatmul.mubr.msk.f32.gmra.mrb[2].mxu0 %vm365_vm2, %v1329_v40 }
  0xc2   : > { %v529_v59 = vpop.permute.xlu0 %528 }
  0xc3   : > { %vm533_vm4 = vcmp.eq.s32.totalorder %v529_v59, %v1559_v37  ;;  %vm534_vm5 = vcmp.eq.s32.totalorder %v529_v59, %v1562_v38 }
  0xca   : > { %v567_v55 = vpop.permute.xlu1 %566  ;;  %v609_v61 = vpop.permute.xlu0 %608 }
  0xcb   : > { %vm571_vm6 = vcmp.eq.s32.totalorder %v567_v55, %v1559_v37  ;;  %vm572_vm7 = vcmp.eq.s32.totalorder %v567_v55, %v1562_v38  ;;  %vm613_vm9 = vcmp.eq.s32.totalorder %v609_v61, %v1559_v37  ;;  %vm614_vm10 = vcmp.eq.s32.totalorder %v609_v61, %v1562_v38 }
  0xce   : > { %v1573_v56 = vpop.permute.xlu1 %569 }
  0xd1   : > { %v654_v63 = vpop.permute.xlu0 %653 }
  0xd2   : > { %v532_v57 = vpop.permute.xlu1 %531 }
  0xd6   : > { %v735_v1 = vpop.permute.xlu0 %734 }
  0xd7   : > { %v612_v58 = vpop.permute.xlu1 %611  ;;  %vm740_vm3 = vcmp.eq.s32.totalorder %v735_v1, %v1562_v38 }
  0xd8   : > { %vm616_vm8 = vcmp.eq.s32.totalorder %v612_v58, %v1562_v38 }
  0xdc   : > { %v651_v60 = vpop.permute.xlu1 %650 }
  0xdd   : > { %vm655_vm1 = vcmp.eq.s32.totalorder %v651_v60, %v1559_v37  ;;  %vm656_vm11 = vcmp.eq.s32.totalorder %v651_v60, %v1562_v38 }
  0xe1   : > { %v693_v62 = vpop.permute.xlu1 %692 }
  0xe2   : > { %vm697_vm12 = vcmp.eq.s32.totalorder %v693_v62, %v1559_v37  ;;  %vm698_vm13 = vcmp.eq.s32.totalorder %v693_v62, %v1562_v38 }
  0xe5   : > { %v1575_v0 = vpop.permute.xlu1 %695 }
  0xe6   : > { %vm699_vm15 = vcmp.eq.s32.totalorder %v1575_v0, %v1559_v37  ;;  %vm700_vm14 = vcmp.eq.s32.totalorder %v1575_v0, %v1562_v38 }
  0xea   : > { %v738_v2 = vpop.permute.xlu1 %737 }
  0xeb   : > { %vm741_vm0 = vcmp.eq.s32.totalorder %v738_v2, %v1559_v37  ;;  %vm742_vm2 = vcmp.eq.s32.totalorder %v738_v2, %v1562_v38 }
 0x190   : > { %v982_v49 = vpop.f32.mrb[0].mxu0 }
 0x191   : > { %v983_v50 = vpop.f32.mrb[1].mxu0 }
 0x192   : > { %v984_v51 = vadd.f32 %v983_v50, %v982_v49 }
 0x194   : > { %v985_v52 = vpop.f32.mrb[2].mxu0  ;;  %1020 = vmatprep.mubr.f32.mxu1 %v984_v51 }
 0x195   : > { %v986_v53 = vpop.f32.mrb[3].mxu0  ;;  %1021 = vmatmul.mubr.f32.vlgmr.msra.gmra.mrb[0].mxu1 %v984_v51 }
 0x196   : > { %v987_v54 = vadd.f32 %v986_v53, %v985_v52 }
 0x198   : > { %1022 = vmatprep.mubr.f32.mxu1 %v987_v54 }
 0x199   : > { %1023 = vmatmul.mubr.f32.gmra.mrb[2].mxu1 %v987_v54 }
 0x268   : > { %v516_v3 = vpop.f32.mrb[0].mxu1 }
 0x269   : > { %v518_v4 = vpop.f32.mrb[1].mxu1  ;;  %v575_v5 = vsel %vm571_vm6, %v516_v3, 0.0  ;;  %v537_v6 = vsel %vm533_vm4, %v516_v3, 0.0  ;;  %v617_v7 = vsel %vm613_vm9, %v516_v3, 0.0  ;;  %v659_v8 = vsel %vm655_vm1, %v516_v3, 0.0 }
 0x26a   : > { %v576_v9 = vsel %vm572_vm7, %v518_v4, 0.0  ;;  %v538_v10 = vsel %vm534_vm5, %v518_v4, 0.0  ;;  %v618_v11 = vsel %vm614_vm10, %v518_v4, 0.0  ;;  %v660_v12 = vsel %vm656_vm11, %v518_v4, 0.0 }
 0x26b   : > { %v579_v13 = vadd.f32 %v576_v9, %v575_v5  ;;  %v541_v14 = vadd.f32 %v538_v10, %v537_v6  ;;  %v621_v15 = vadd.f32 %v618_v11, %v617_v7  ;;  %v663_v16 = vadd.f32 %v660_v12, %v659_v8 }
 0x26c   : > { %v522_v17 = vpop.f32.mrb[2].mxu1  ;;  %v701_v18 = vsel %vm697_vm12, %v516_v3, 0.0  ;;  %v702_v19 = vsel %vm698_vm13, %v518_v4, 0.0  ;;  %vm1722_vm4 = vcmp.eq.s32.totalorder %v735_v1, %v1559_v37  ;;  %v744_v21 = vsel %vm740_vm3, %v518_v4, 0.0 }
 0x26d   : > { %v743_v20 = vsel %vm1722_vm4, %v516_v3, 0.0  ;;  %580 = vadd.xlane.f32.xlu1 %v579_v13  ;;  %542 = vadd.xlane.f32.xlu0 %v541_v14  ;;  %v524_v22 = vpop.f32.mrb[3].mxu1  ;;  %vm1723_vm5 = vcmp.eq.s32.totalorder %v532_v57, %v1559_v37  ;;  %vm1724_vm6 = vcmp.eq.s32.totalorder %v612_v58, %v1559_v37  ;;  %vm1725_vm7 = vcmp.eq.s32.totalorder %v1573_v56, %v1559_v37 }
 0x26e   : > { %v539_v23 = vsel %vm1723_vm5, %v522_v17, 0.0  ;;  %v619_v24 = vsel %vm1724_vm6, %v522_v17, 0.0  ;;  %v577_v25 = vsel %vm1725_vm7, %v522_v17, 0.0  ;;  %vm1726_vm9 = vcmp.eq.s32.totalorder %v654_v63, %v1559_v37 }
 0x26f   : > { %v661_v26 = vsel %vm1726_vm9, %v522_v17, 0.0  ;;  %vm1727_vm10 = vcmp.eq.s32.totalorder %v532_v57, %v1562_v38  ;;  %v620_v28 = vsel %vm616_vm8, %v524_v22, 0.0  ;;  %vm1728_vm11 = vcmp.eq.s32.totalorder %v1573_v56, %v1562_v38 }
 0x270   : > { %v540_v27 = vsel %vm1727_vm10, %v524_v22, 0.0  ;;  %v578_v29 = vsel %vm1728_vm11, %v524_v22, 0.0  ;;  %vm1729_vm12 = vcmp.eq.s32.totalorder %v654_v63, %v1562_v38  ;;  %v624_v32 = vadd.f32 %v620_v28, %v619_v24 }
 0x271   : > { %v662_v30 = vsel %vm1729_vm12, %v524_v22, 0.0  ;;  %v544_v31 = vadd.f32 %v540_v27, %v539_v23  ;;  %v582_v33 = vadd.f32 %v578_v29, %v577_v25  ;;  %v705_v35 = vadd.f32 %v702_v19, %v701_v18  ;;  %622 = vadd.xlane.f32.xlu0 %v621_v15 }
 0x272   : > { %v666_v34 = vadd.f32 %v662_v30, %v661_v26  ;;  %v703_v39 = vsel %vm699_vm15, %v522_v17, 0.0  ;;  %v704_v40 = vsel %vm700_vm14, %v524_v22, 0.0  ;;  %v747_v41 = vadd.f32 %v744_v21, %v743_v20 }
 0x273   : > { %545 = vadd.xlane.f32.xlu1 %v544_v31  ;;  %v708_v42 = vadd.f32 %v704_v40, %v703_v39  ;;  %v745_v43 = vsel %vm741_vm0, %v522_v17, 0.0  ;;  %v746_v44 = vsel %vm742_vm2, %v524_v22, 0.0  ;;  %vm788_vm13 = vcmask 7168  }
 0x274   : > { %v750_v45 = vadd.f32 %v746_v44, %v745_v43 }
 0x275   : > { %664 = vadd.xlane.f32.xlu0 %v663_v16 }
 0x277   : > { %625 = vadd.xlane.f32.xlu1 %v624_v32 }
 0x279   : > { %583 = vadd.xlane.f32.xlu0 %v582_v33 }
 0x27b   : > { %667 = vadd.xlane.f32.xlu1 %v666_v34 }
 0x27d   : > { %706 = vadd.xlane.f32.xlu0 %v705_v35 }
 0x27f   : > { %709 = vadd.xlane.f32.xlu1 %v708_v42 }
 0x281   : > { %748 = vadd.xlane.f32.xlu0 %v747_v41 }
 0x283   : > { %751 = vadd.xlane.f32.xlu1 %v750_v45 }
 0x2fa   : > { %v581_v46 = vpop.xlane.xlu1 %580  ;;  %v543_v47 = vpop.xlane.xlu0 %542 }
 0x2fb   : > { %v585_v48 = vsub.f32 0.0, %v581_v46  ;;  %v933_v49 = vmul.f32 -1.442695, %v543_v47 }
 0x2fd   : > { %v935_v50 = vmul.f32 -1.442695, %v585_v48  ;;  %1157 = vpow2.f32 %v933_v49 }
 0x2fe   : > { %v623_v37 = vpop.xlane.xlu0 %622 }
 0x2ff   : > { %1159 = vpow2.f32 %v935_v50  ;;  %v627_v38 = vsub.f32 0.0, %v623_v37 }
 0x300   : > { %v546_v51 = vpop.xlane.xlu1 %545 }
 0x301   : > { %v934_v52 = vmul.f32 -1.442695, %v546_v51  ;;  %v937_v53 = vmul.f32 -1.442695, %v627_v38 }
 0x302   : > { %v665_v54 = vpop.xlane.xlu0 %664 }
 0x303   : > { %1161 = vpow2.f32 %v934_v52  ;;  %v669_v56 = vsub.f32 0.0, %v665_v54 }
 0x304   : > { %v626_v55 = vpop.xlane.xlu1 %625  ;;  %1163 = vpow2.f32 %v937_v53 }
 0x305   : > { %v628_v57 = vsub.f32 0.0, %v626_v55  ;;  %v939_v58 = vmul.f32 -1.442695, %v669_v56 }
 0x306   : > { %v584_v60 = vpop.xlane.xlu0 %583 }
 0x307   : > { %v938_v59 = vmul.f32 -1.442695, %v628_v57  ;;  %v1158_v62 = vpop.eup %1157  ;;  %1165 = vpow2.f32 %v939_v58  ;;  %v586_v63 = vsub.f32 0.0, %v584_v60 }
 0x308   : > { %v668_v61 = vpop.xlane.xlu1 %667  ;;  %v553_v1 = vadd.f32 1.0, %v1158_v62 }
 0x309   : > { %v670_v0 = vsub.f32 0.0, %v668_v61  ;;  %1167 = vpow2.f32 %v938_v59  ;;  %v1160_v2 = vpop.eup %1159  ;;  %v936_v3 = vmul.f32 -1.442695, %v586_v63 }
 0x30a   : > { %v593_v5 = vadd.f32 1.0, %v1160_v2  ;;  %1169 = vrcp.f32 %v553_v1  ;;  %v707_v6 = vpop.xlane.xlu0 %706 }
 0x30b   : > { %v940_v4 = vmul.f32 -1.442695, %v670_v0  ;;  %1171 = vpow2.f32 %v936_v3  ;;  %v711_v9 = vsub.f32 0.0, %v707_v6 }
 0x30c   : > { %v710_v7 = vpop.xlane.xlu1 %709  ;;  %1173 = vrcp.f32 %v593_v5 }
 0x30d   : > { %v1162_v8 = vpop.eup %1161  ;;  %v712_v10 = vsub.f32 0.0, %v710_v7  ;;  %1175 = vpow2.f32 %v940_v4  ;;  %v941_v13 = vmul.f32 -1.442695, %v711_v9 }
 0x30e   : > { %v554_v11 = vadd.f32 1.0, %v1162_v8  ;;  %v1164_v12 = vpop.eup %1163  ;;  %v749_v16 = vpop.xlane.xlu0 %748 }
 0x30f   : > { %v942_v14 = vmul.f32 -1.442695, %v712_v10  ;;  %v635_v15 = vadd.f32 1.0, %v1164_v12  ;;  %v753_v18 = vsub.f32 0.0, %v749_v16  ;;  %v779_v12 = vshrl.u32 %v354_v36, 7 }
 0x310   : > { %1177 = vrcp.f32 %v554_v11  ;;  %v752_v17 = vpop.xlane.xlu1 %751 }
 0x311   : > { %1179 = vpow2.f32 %v941_v13  ;;  %v754_v19 = vsub.f32 0.0, %v752_v17  ;;  %v1166_v20 = vpop.eup %1165  ;;  %v943_v21 = vmul.f32 -1.442695, %v753_v18  ;;  %v781_v18 = vstv %s945_s8 }
 0x312   : > { %1181 = vrcp.f32 %v635_v15  ;;  %v677_v23 = vadd.f32 1.0, %v1166_v20 }
 0x313   : > { %1183 = vpow2.f32 %v942_v14  ;;  %v1168_v22 = vpop.eup %1167  ;;  %v944_v24 = vmul.f32 -1.442695, %v754_v19 }
 0x314   : > { %v636_v25 = vadd.f32 1.0, %v1168_v22  ;;  %1185 = vpow2.f32 %v943_v21  ;;  %v1170_v26 = vpop.eup %1169 }
 0x315   : > { %1187 = vrcp.f32 %v677_v23  ;;  %v1172_v27 = vpop.eup %1171  ;;  %v559_v31 = vadd.f32 1e-10, %v1170_v26  ;;  %v780_v26 = vadd.s32 8, %v779_v12 }
 0x316   : > { %1189 = vrcp.f32 %v636_v25  ;;  %v1174_v28 = vpop.eup %1173  ;;  %v594_v29 = vadd.f32 1.0, %v1172_v27 }
 0x317   : > { %1191 = vpow2.f32 %v944_v24  ;;  %v1176_v30 = vpop.eup %1175  ;;  %v599_v35 = vadd.f32 1e-10, %v1174_v28 }
 0x318   : > { %1193 = vrcp.f32 %v594_v29  ;;  %v678_v33 = vadd.f32 1.0, %v1176_v30  ;;  %v782_v29 = vadd.s32 %v781_v18, %v779_v12 }
 0x31a   : > { %v1178_v32 = vpop.eup %1177  ;;  %1195 = vrcp.f32 %v678_v33  ;;  %vm784_vm8 = vcmp.lt.s32.totalorder %v782_v29, 72 }
 0x31b   : > { %v1180_v34 = vpop.eup %1179  ;;  %1197 = vlog2.f32 %v559_v31  ;;  %v560_v42 = vadd.f32 1e-10, %v1178_v32 }
 0x31c   : > { %v1182_v39 = vpop.eup %1181  ;;  %v719_v40 = vadd.f32 1.0, %v1180_v34  ;;  %v783_v34 = vadd.s32 %v781_v18, %v780_v26 }
 0x31d   : > { %v1184_v41 = vpop.eup %1183  ;;  %v641_v45 = vadd.f32 1e-10, %v1182_v39 }
 0x31e   : > { %1199 = vrcp.f32 %v719_v40  ;;  %v720_v43 = vadd.f32 1.0, %v1184_v41  ;;  %v1186_v44 = vpop.eup %1185  ;;  %vm785_vm14 = vcmp.lt.s32.totalorder %v783_v34, 72 }
 0x31f   : > { %1201 = vlog2.f32 %v599_v35  ;;  %v1188_v46 = vpop.eup %1187  ;;  %v761_v47 = vadd.f32 1.0, %v1186_v44 }
 0x320   : > { %1203 = vrcp.f32 %v720_v43  ;;  %v1190_v48 = vpop.eup %1189  ;;  %v683_v49 = vadd.f32 1e-10, %v1188_v46 }
 0x321   : > { %1205 = vlog2.f32 %v560_v42  ;;  %v1192_v50 = vpop.eup %1191  ;;  %v642_v37 = vadd.f32 1e-10, %v1190_v48 }
 0x322   : > { %1207 = vrcp.f32 %v761_v47  ;;  %v762_v51 = vadd.f32 1.0, %v1192_v50  ;;  %v1194_v38 = vpop.eup %1193 }
 0x323   : > { %1209 = vlog2.f32 %v641_v45  ;;  %v600_v52 = vadd.f32 1e-10, %v1194_v38 }
 0x324   : > { %1211 = vlog2.f32 %v683_v49  ;;  %v1196_v53 = vpop.eup %1195 }
 0x325   : > { %1213 = vrcp.f32 %v762_v51  ;;  %v1198_v54 = vpop.eup %1197  ;;  %v684_v55 = vadd.f32 1e-10, %v1196_v53 }
 0x326   : > { %1215 = vlog2.f32 %v642_v37  ;;  %v562_v7 = vmul.f32 0.6931472, %v1198_v54 }
 0x327   : > { %1217 = vlog2.f32 %v600_v52 }
 0x328   : > { %v1200_v56 = vpop.eup %1199  ;;  %1219 = vlog2.f32 %v684_v55 }
 0x329   : > { %v1202_v57 = vpop.eup %1201  ;;  %v725_v58 = vadd.f32 1e-10, %v1200_v56 }
 0x32a   : > { %v1204_v59 = vpop.eup %1203  ;;  %v602_v4 = vmul.f32 0.6931472, %v1202_v57 }
 0x32b   : > { %v1206_v60 = vpop.eup %1205  ;;  %1221 = vlog2.f32 %v725_v58  ;;  %v726_v61 = vadd.f32 1e-10, %v1204_v59 }
 0x32c   : > { %v1208_v62 = vpop.eup %1207  ;;  %v564_v9 = vmul.f32 0.6931472, %v1206_v60  ;;  %v605_v13 = vadd.f32 %v602_v4, %v562_v7 }
 0x32d   : > { %v1210_v63 = vpop.eup %1209  ;;  %1223 = vlog2.f32 %v726_v61  ;;  %v767_v0 = vadd.f32 1e-10, %v1208_v62 }
 0x32e   : > { %v1212_v1 = vpop.eup %1211  ;;  %v644_v8 = vmul.f32 0.6931472, %v1210_v63 }
 0x32f   : > { %v1214_v2 = vpop.eup %1213  ;;  %1225 = vlog2.f32 %v767_v0  ;;  %v686_v14 = vmul.f32 0.6931472, %v1212_v1 }
 0x330   : > { %v1216_v3 = vpop.eup %1215  ;;  %v768_v5 = vadd.f32 1e-10, %v1214_v2  ;;  %v647_v20 = vadd.f32 %v644_v8, %v605_v13 }
 0x331   : > { %v1218_v6 = vpop.eup %1217  ;;  %v646_v15 = vmul.f32 0.6931472, %v1216_v3 }
 0x332   : > { %v604_v10 = vmul.f32 0.6931472, %v1218_v6  ;;  %1227 = vlog2.f32 %v768_v5  ;;  %v1220_v11 = vpop.eup %1219  ;;  %v689_v24 = vadd.f32 %v686_v14, %v647_v20 }
 0x333   : > { %v688_v19 = vmul.f32 0.6931472, %v1220_v11 }
 0x334   : > { %v606_v16 = vadd.f32 %v604_v10, %v564_v9 }
 0x335   : > { %v1222_v17 = vpop.eup %1221 }
 0x336   : > { %v648_v21 = vadd.f32 %v646_v15, %v606_v16  ;;  %v728_v22 = vmul.f32 0.6931472, %v1222_v17 }
 0x337   : > { %v1224_v23 = vpop.eup %1223 }
 0x338   : > { %v690_v25 = vadd.f32 %v688_v19, %v648_v21  ;;  %v730_v28 = vmul.f32 0.6931472, %v1224_v23  ;;  %v731_v30 = vadd.f32 %v728_v22, %v689_v24 }
 0x339   : > { %v1226_v27 = vpop.eup %1225 }
 0x33a   : > { %v770_v31 = vmul.f32 0.6931472, %v1226_v27  ;;  %v732_v36 = vadd.f32 %v730_v28, %v690_v25 }
 0x33c   : > { %v1228_v32 = vpop.eup %1227  ;;  %v773_v33 = vadd.f32 %v770_v31, %v731_v30 }
 0x33d   : > { %v772_v35 = vmul.f32 0.6931472, %v1228_v32 }
 0x33e   : > { %v775_v39 = vsub.f32 0.0, %v773_v33 }
 0x33f   : > { %v774_v40 = vadd.f32 %v772_v35, %v732_v36 }
 0x340   : > { %v786_v41 = vsel %vm784_vm8, %v775_v39, 0.0 }
 0x341   : > { %v776_v42 = vsub.f32 0.0, %v774_v40  ;;  %v789_v43 = vsel %vm788_vm13, %v786_v41, 0.0 }
 0x343   : > { %v787_v44 = vsel %vm785_vm14, %v776_v42, 0.0 }
 0x344   : > { %v790_v45 = vsel %vm788_vm13, %v787_v44, 0.0 }
 0x345   : > { %v791_v46 = vadd.f32 %v790_v45, %v789_v43 }
 0x347   : > { %792 = vadd.xlane.f32.xlu0 %v791_v46 }
 0x3d4   : > { %v793_v47 = vpop.xlane.xlu0 %792 }
 0x3d5   : > { %v794_v48 = vrot.slane %v793_v47, 4 }
 0x3d7   : > { %v795_v49 = vadd.f32 %v794_v48, %v793_v47 }
 0x3d9   : > { %v796_v50 = vrot.slane %v795_v49, 2 }
 0x3db   : > { %v797_v37 = vadd.f32 %v796_v50, %v795_v49 }
 0x3dd   : > { %v798_v51 = vrot.slane %v797_v37, 1 }
 0x3df   : > { %v799_v38 = vadd.f32 %v798_v51, %v797_v37 }
 0x3e1   : > { %1088 = vpush %v799_v38 }
 0x412   : > { %s1089_s13 = spop %1088 }
 0x413   : > { %v801_v52 = vstv %s1089_s13 }
 0x414   : > { %802 = vst [vmem:[%s265_s10] sm:$0xff] %v801_v52 }
 0x415   : > { %1270 = shalt.err (!%p1267_p7)
}
 0x416   : > { %s1271_s6 = scalar_lea.hbm %s1666_s16, 128  ;;  %s1275_s30 = scalar_lea.hbm %s1711_s5, 640 }
 0x417   : > { %p1272_p8 = scmp.ne.s32.totalorder %s1666_s16, %s1271_s6  ;;  %p1276_p1 = scmp.lt.u32.totalorder %s1666_s16, %s1711_s5 }
 0x418   : > { %p1277_p0 = scmp.lt.u32.totalorder %s1275_s30, %s1271_s6  ;;  %p1279_p6 = scmp.lt.u32.totalorder %s1271_s6, %s1666_s16 }
 0x419   : > { %p1273_p11 = pnand %p1272_p8, %p1730_p9 }
 0x41a   : > { %p1278_p5 = por %p1277_p0, %p1276_p1 }
 0x41b   : > { %p1274_p13 = pneg %p1273_p11 }
 0x41c   : > { %p1280_p10 = por %p1279_p6, %p1278_p5 }
 0x41e   : > { %p1281_p12 = pnand %p1280_p10, %p1274_p13 }
 0x420   : > { %1284 = shalt.err (!%p1281_p12)
}
 0x421   : > { %1094 = dma.vmem_to_hbm [thread:$0]  (%p1730_p9), %s1661_s11, 128, %s1666_s16, %s804_s17  }
 0x422 PF: > { %p1106_p2 = scmp.ge.s32.totalorder %s1323_s21, 2  ;;  %s829_s12 = sand.u32 1, %s1311_s18  }
 0x423   : > { %p1731_p3 = scmp.ne.s32.totalorder %s1716_s29, 0  ;;  %s830_s13 = scalar_lea.sflag [#allocation4], %s829_s12 }
 0x425   : > { %p1101_p4 = pnand %p1106_p2, %p1731_p3 }
 0x427   : > { %1306 = dma.done.wait (!%p1101_p4), %s830_s13, 128  }
 0x428   : > { %1308 = vsyncadd (!%p1101_p4), %s830_s13, 4294967168  ;;  %p16_p7 = scmp.ge.s32.totalorder %s1390_s24, 7   ;;  %s1732_s18 = smov %s1315_s19 }
 0x429   : > { %s1733_s19 = smov %s1319_s20  ;;  %s1734_s20 = smov %s1401_s27 }
 0x42a   : > { %s1735_s21 = smov %s1390_s24  ;;  %18 = sbr.rel (!%p16_p7) target bundleno = 4 (0x4), region = 86 }
 0x431   :  { %835 = vsyncpa [#allocation3], 1 }
 0x432   :  { %837 = vsyncpa [#allocation3 + $0x1], 1 }
 0x433   :  { %838 = vsyncpa [#allocation4], 1 }
 0x434   :  { %840 = vsyncpa [#allocation4 + $0x1], 1 }

</bundles_post_ra>
